<compile_context>
chip_gen: v7x
topology: tpu7x:2x2x1
jax: 0.10.0
libtpu: 0.0.40
codegen_flags: <defaults>
</compile_context>

<pallas_src>
import jax
import jax.numpy as jnp
import numpy as np
from jax.experimental import pallas as pl
from jax.experimental.pallas import tpu as pltpu


# ----------------------------------------------------------------------------
# Kernel
# ----------------------------------------------------------------------------
def _normalize_kernel(x_ref, sb_ref, o_ref):
    """o = x * scale + bias, per row.

    x_ref : (R, L)  activation tile in its native dtype (rows = channel slabs)
    sb_ref: (R, 2)  packed per-row [scale, bias] = [1/std, -mean/std]
    o_ref : (R, L)  float32 output tile
    """
    x = x_ref[...].astype(jnp.float32)
    scale = sb_ref[:, 0:1]          # (R, 1) — lane broadcast
    bias = sb_ref[:, 1:2]
    o_ref[...] = (x * scale + bias).astype(o_ref.dtype)


# ----------------------------------------------------------------------------
# Tiling heuristic: multi-MiB blocks, dense sublanes/lanes, exact divisors.
# ----------------------------------------------------------------------------
def _pick_tiles(rows, cols, bytes_per_elem, target_bytes=4 << 20):
    # Lane (last-dim) tile: full H*W unless even an 8-row slab would blow the
    # per-block byte target; then pick a multiple of 128 that divides cols.
    lane = cols
    if cols % 128 == 0:
        max_lane = max(128, ((target_bytes // (8 * bytes_per_elem)) // 128) * 128)
        if lane > max_lane:
            t = max_lane
            while t >= 128 and cols % t != 0:
                t -= 128
            if t >= 128:
                lane = t

    # Row (sublane) tile: multiple of 8 when possible, exact divisor of rows.
    per_row = lane * bytes_per_elem
    r = max(1, int(target_bytes // per_row))
    r = min(r, rows)
    if rows % 8 == 0:
        r = max(8, (r // 8) * 8)
        while rows % r != 0:
            r -= 8
    else:
        while rows % r != 0:
            r -= 1

    # Give the v7x megacore at least 2 grid blocks when blocks stay >=1 MiB.
    if (rows // r) * (cols // lane) < 2 and r == rows and rows % 16 == 0:
        half = rows // 2
        if half % 8 == 0 and half * per_row >= (1 << 20):
            r = half
    return r, lane


# ----------------------------------------------------------------------------
# Wrapper
# ----------------------------------------------------------------------------
def normalizer_forward(x_nchw, mean, std):
    """x_nchw: (N, C, H, W) in any real dtype.  mean/std: (C,) or (C,1,1)."""
    N, C, H, W = x_nchw.shape
    HW = H * W
    rows = N * C

    in_dtype = x_nchw.dtype
    out_dtype = jnp.promote_types(in_dtype, jnp.float32)

    # Free reshape: row index = n*C + c, spatial contiguous on lanes.
    x2d = x_nchw.reshape(rows, HW)

    # Fold (x - mean)/std into one FMA: scale = 1/std, bias = -mean/std.
    mean_c = jnp.asarray(mean, jnp.float32).reshape(-1)
    std_c = jnp.asarray(std, jnp.float32).reshape(-1)
    scale_c = 1.0 / std_c
    bias_c = -mean_c * scale_c
    # Row order of x2d is n*C + c, so tiling the C-vectors N times lines up.
    sb = jnp.stack([jnp.tile(scale_c, N), jnp.tile(bias_c, N)], axis=1)  # (rows, 2) f32

    bytes_per_elem = jnp.dtype(in_dtype).itemsize + jnp.dtype(out_dtype).itemsize
    row_tile, lane_tile = _pick_tiles(rows, HW, bytes_per_elem)
    grid = (rows // row_tile, HW // lane_tile)

    out = pl.pallas_call(
        _normalize_kernel,
        out_shape=jax.ShapeDtypeStruct((rows, HW), out_dtype),
        grid=grid,
        in_specs=[
            pl.BlockSpec((row_tile, lane_tile), lambda i, j: (i, j)),
            pl.BlockSpec((row_tile, 2), lambda i, j: (i, 0)),
        ],
        out_specs=pl.BlockSpec((row_tile, lane_tile), lambda i, j: (i, j)),
        compiler_params=pltpu.CompilerParams(
            dimension_semantics=("parallel", "parallel"),
            vmem_limit_bytes=32 * 1024 * 1024,  # safe on v5e(128) / v6e(128) / v7x(64) MiB
        ),
    )(x2d, sb)
    return out.reshape(N, C, H, W)


# ----------------------------------------------------------------------------
# Pure-JAX reference (mirrors the torch module exactly)
# ----------------------------------------------------------------------------
def reference(x_nchw, mean, std):
    m = jnp.asarray(mean, jnp.float32).reshape(1, -1, 1, 1)
    s = jnp.asarray(std, jnp.float32).reshape(1, -1, 1, 1)
    return (x_nchw.astype(jnp.float32) - m) / s


# ----------------------------------------------------------------------------
# Main
# ----------------------------------------------------------------------------
if __name__ == "__main__":
    key = jax.random.PRNGKey(0)
    kx, km, ks, kx2, kx3 = jax.random.split(key, 5)

    # Case 1: small NCHW batch (N*C = 8 rows, 256 lanes).
    N, C, H, W = 2, 4, 16, 16
    x = jax.random.normal(kx, (N, C, H, W), jnp.float32)
    mean = 0.5 * jax.random.normal(km, (C,), jnp.float32)
    std = 0.5 + jax.nn.softplus(jax.random.normal(ks, (C,), jnp.float32))

    out = jax.block_until_ready(normalizer_forward(x, mean, std))
    np.testing.assert_allclose(
        np.asarray(out), np.asarray(reference(x, mean, std)), rtol=1e-5, atol=1e-6
    )

    # Case 2: ImageNet-style 3-channel normalization (rows = 6, not a multiple of 8:
    # block falls back to the full row dim, still legal and dense on lanes).
    N2, C2, H2, W2 = 2, 3, 32, 32
    x2 = jax.random.normal(kx2, (N2, C2, H2, W2), jnp.float32)
    mean2 = jnp.array([0.485, 0.456, 0.406], jnp.float32)
    std2 = jnp.array([0.229, 0.224, 0.225], jnp.float32)

    out2 = jax.block_until_ready(normalizer_forward(x2, mean2, std2))
    np.testing.assert_allclose(
        np.asarray(out2), np.asarray(reference(x2, mean2, std2)), rtol=1e-5, atol=1e-6
    )

    # Case 3: bf16 input — exercises the in-kernel upcast (no wrapper HBM cast pass).
    N3, C3, H3, W3 = 4, 8, 32, 32
    x3 = jax.random.normal(kx3, (N3, C3, H3, W3), jnp.float32).astype(jnp.bfloat16)
    mean3 = 0.1 * jnp.arange(C3, dtype=jnp.float32)
    std3 = 0.5 + 0.05 * jnp.arange(C3, dtype=jnp.float32)

    out3 = jax.block_until_ready(normalizer_forward(x3, mean3, std3))
    np.testing.assert_allclose(
        np.asarray(out3), np.asarray(reference(x3, mean3, std3)), rtol=1e-5, atol=1e-5
    )

    print("KERNEL_OK")
</pallas_src>

<mosaic_0001>
module attributes {stable_mosaic.version = 11 : i64} {
  func.func @_normalize_kernel(%arg0: i32, %arg1: i32, %arg2: memref<8x256xf32, #tpu.memory_space<vmem>>, %arg3: memref<8x2xf32, #tpu.memory_space<vmem>>, %arg4: memref<8x256xf32, #tpu.memory_space<vmem>>) attributes {dimension_semantics = [#tpu.dimension_semantics<parallel>, #tpu.dimension_semantics<parallel>], iteration_bounds = array<i64: 1, 1>, scalar_prefetch = 0 : i64, scratch_operands = 0 : i64, tpu.core_type = #tpu.core_type<tc>, window_params = [{transform_indices = @transform_0, window_bounds = array<i64: 8, 256>}, {transform_indices = @transform_1, window_bounds = array<i64: 8, 2>}, {transform_indices = @transform_2, window_bounds = array<i64: 8, 256>}]} {
    %c0 = arith.constant 0 : index
    %c0_0 = arith.constant 0 : index
    %0 = vector.load %arg2[%c0, %c0_0] : memref<8x256xf32, #tpu.memory_space<vmem>>, vector<8x256xf32>
    %c0_1 = arith.constant 0 : index
    %c0_2 = arith.constant 0 : index
    %1 = vector.load %arg3[%c0_1, %c0_2] : memref<8x2xf32, #tpu.memory_space<vmem>>, vector<8x1xf32>
    %c0_3 = arith.constant 0 : index
    %c1 = arith.constant 1 : index
    %2 = vector.load %arg3[%c0_3, %c1] : memref<8x2xf32, #tpu.memory_space<vmem>>, vector<8x1xf32>
    %3 = vector.broadcast %1 : vector<8x1xf32> to vector<8x256xf32>
    %4 = arith.mulf %0, %3 : vector<8x256xf32>
    %5 = vector.broadcast %2 : vector<8x1xf32> to vector<8x256xf32>
    %6 = arith.addf %4, %5 : vector<8x256xf32>
    %c0_4 = arith.constant 0 : index
    %c0_5 = arith.constant 0 : index
    %7 = vector.load %arg4[%c0_4, %c0_5] : memref<8x256xf32, #tpu.memory_space<vmem>>, vector<8x256xf32>
    tpu.vector_store %arg4[%c0_4, %c0_5], %6 {strides = array<i32>} : memref<8x256xf32, #tpu.memory_space<vmem>>, vector<8x256xf32>,
    return
  }
  func.func @transform_0(%arg0: i32, %arg1: i32) -> (i32, i32) {
    %c0_i32 = arith.constant 0 : i32
    return %arg0, %arg1 : i32, i32
  }
  func.func @transform_1(%arg0: i32, %arg1: i32) -> (i32, i32) {
    %c0_i32 = arith.constant 0 : i32
    %c0_i32_0 = arith.constant 0 : i32
    return %arg0, %c0_i32 : i32, i32
  }
  func.func @transform_2(%arg0: i32, %arg1: i32) -> (i32, i32) {
    %c0_i32 = arith.constant 0 : i32
    return %arg0, %arg1 : i32, i32
  }
}

</mosaic_0001>

<bundles_post_ra>
// kernel: tpu_custom_call.1
= control target key start
LH: loop header
LB: loop body
LE: loop exit
PB: predicated region body
PF: predicated region fallthrough
CT: control target
= control target key end

     0   :  { %7 = vsyncpa [#allocation3], 0  ;;  %s157_s0 = inlined_call_operand.hbm [shape: f32[8,256], index: 0, kind: input, shape index: {}]   ;;  %s158_s1 = inlined_call_operand.vmem [shape: f32[8,2], index: 1, kind: input, shape index: {}]   ;;  %s159_s2 = inlined_call_operand.hbm [shape: f32[8,256], index: 2, kind: output, shape index: {}]  }
   0x1   :  { %8 = vsyncpa [#allocation4], 0  ;;  %s111_s9 = smov [#allocation2]   ;;  %s63_s13 = scalar_lea.hbm %s157_s0, 256 }
   0x2   :  { %s15_s10 = sshll.u32 %s111_s9, 4  ;;  %p64_p0 = scmp.ne.s32.totalorder %s157_s0, %s63_s13  ;;  %s16_s10 = int_to_ptr.vmem [resolvable:$true] %s15_s10 }
   0x3   :  { %p67_p1 = scmp.lt.u32.totalorder %s63_s13, %s157_s0 }
   0x5   :  { %p69_p2 = pnand %p67_p1, %p64_p0 }
   0x7   :  { %72 = shalt.err (!%p69_p2)
}
   0x8   :  { %s73_s18 = scalar_lea.vmem %s16_s10, 256  ;;  %p78_p4 = scmp.lt.s32.totalorder %s16_s10, %s16_s10 }
   0x9   :  { %p74_p3 = scmp.ne.s32.totalorder %s16_s10, %s73_s18  ;;  %p79_p5 = scmp.lt.s32.totalorder %s73_s18, %s73_s18 }
   0xb   :  { %p80_p6 = por %p79_p5, %p78_p4 }
   0xd   :  { %p81_p7 = pnand %p80_p6, %p74_p3 }
   0xf   :  { %84 = shalt.err (!%p81_p7)
}
  0x10   :  { %18 = dma.hbm_to_vmem [thread:$0]  %s157_s0, 256, %s16_s10, [#allocation3]  }
  0x11   :  { %107 = dma.done.wait [#allocation3], 256  }
  0x12   :  { %108 = vsyncadd [#allocation3], 4294967040  ;;  %v112_v0 = vmov 0   ;;  %v26_v1 = vld [vmem:[%s158_s1] sm:$0xff]  ;;  %v113_v2 = vmov 1   ;;  %v25_v5 = vld [vmem:[#allocation2 + $0x8] sm:$0xff] }
  0x13   :  { %61 = vset.pattern.permute.xlu0 %v112_v0  ;;  %v24_v4 = vld [vmem:[#allocation2] sm:$0xff]  ;;  %s114_s23 = smov [#allocation5]  }
  0x14   :  { %29 = vperm.xlu0 %61, %v26_v1   ;;  %s48_s24 = sshll.u32 %s114_s23, 4  ;;  %s49_s24 = int_to_ptr.vmem [resolvable:$true] %s48_s24 }
  0x15   :  { %s85_s0 = scalar_lea.vmem %s49_s24, 256  ;;  %p90_p9 = scmp.lt.s32.totalorder %s49_s24, %s49_s24 }
  0x16   :  { %p86_p8 = scmp.ne.s32.totalorder %s49_s24, %s85_s0  ;;  %p91_p10 = scmp.lt.s32.totalorder %s85_s0, %s85_s0 }
  0x18   :  { %62 = vset.pattern.permute.xlu0 %v113_v2  ;;  %p92_p11 = por %p91_p10, %p90_p9 }
  0x19   :  { %35 = vperm.xlu0 %62, %v26_v1  }
  0x1a   :  { %p93_p12 = pnand %p92_p11, %p86_p8 }
  0x93   :  { %v30_v3 = vpop.permute.xlu0 %29 }
  0x94   :  { %v32_v6 = vmul.f32 %v30_v3, %v24_v4  ;;  %v33_v7 = vmul.f32 %v30_v3, %v25_v5 }
  0x98   :  { %v36_v8 = vpop.permute.xlu0 %35 }
  0x99   :  { %v38_v9 = vadd.f32 %v36_v8, %v32_v6  ;;  %v39_v10 = vadd.f32 %v36_v8, %v33_v7 }
  0x9b   :  { %40 = vst [vmem:[#allocation5] sm:$0xff] %v38_v9  ;;  %41 = vst [vmem:[#allocation5 + $0x8] sm:$0xff] %v39_v10 }
  0x9c   :  { %96 = shalt.err (!%p93_p12)
}
  0x9d   :  { %s97_s26 = scalar_lea.hbm %s159_s2, 256 }
  0x9e   :  { %p98_p13 = scmp.ne.s32.totalorder %s159_s2, %s97_s26  ;;  %p101_p0 = scmp.lt.u32.totalorder %s97_s26, %s159_s2 }
  0xa0   :  { %p103_p1 = pnand %p101_p0, %p98_p13 }
  0xa2   :  { %106 = shalt.err (!%p103_p1)
}
  0xa3   :  { %51 = dma.vmem_to_hbm [thread:$0]  %s49_s24, 256, %s159_s2, [#allocation4]  }
  0xa4   :  { %109 = dma.done.wait [#allocation4], 256  }
  0xa5   :  { %110 = vsyncadd [#allocation4], 4294967040 }
  0xa6   :  { %55 = vsyncpa [#allocation3], 1 }
  0xa7   :  { %56 = vsyncpa [#allocation4], 1 }

</bundles_post_ra>
